<compile_context>
chip_gen: v7x
topology: tpu7x:2x2x1
jax: 0.10.0
libtpu: 0.0.40
codegen_flags: <defaults>
</compile_context>

<pallas_src>
import functools

import jax
import jax.numpy as jnp
from jax.experimental import pallas as pl
from jax.experimental.pallas import tpu as pltpu

BN_EPS = 1e-5


def _round_up(x, n):
    return (x + n - 1) // n * n


# ---------------------------------------------------------------------------
# Phase 1: conv-as-matmul + per-tile partial BN statistics
#   grid = (num_m_tiles, num_k_tiles); K is the reduction axis (last).
# ---------------------------------------------------------------------------
def _conv_stats_kernel(col_ref, w_ref, conv_ref, stats_ref, acc_ref):
    k = pl.program_id(1)

    @pl.when(k == 0)
    def _():
        acc_ref[...] = jnp.zeros_like(acc_ref)

    acc_ref[...] += jnp.dot(col_ref[...], w_ref[...],
                            preferred_element_type=jnp.float32)

    @pl.when(k == pl.num_programs(1) - 1)
    def _():
        acc = acc_ref[...]                      # (tm, Cout_pad) f32
        conv_ref[...] = acc
        part = jnp.concatenate(
            [jnp.sum(acc, axis=0, keepdims=True),           # per-channel sum
             jnp.sum(acc * acc, axis=0, keepdims=True)],    # per-channel sum sq
            axis=0)                                          # (2, Cout_pad)
        stats_ref[...] = part[None]                          # (1, 2, Cout_pad)


# ---------------------------------------------------------------------------
# Phase 2: y = max(conv * scale + shift, 0)   (scale/shift fold BN + gamma/beta)
# ---------------------------------------------------------------------------
def _bn_relu_kernel(conv_ref, scale_ref, shift_ref, out_ref):
    y = conv_ref[...] * scale_ref[...] + shift_ref[...]
    out_ref[...] = jnp.maximum(y, 0.0).astype(out_ref.dtype)


def _im2col_nhwc(x, kh, kw, stride, padding, dilation):
    """NCHW -> (N*OH*OW, KH*KW*Cin) im2col, (kh, kw, cin)-major columns."""
    n, c, h, w = x.shape
    oh = (h + 2 * padding - dilation * (kh - 1) - 1) // stride + 1
    ow = (w + 2 * padding - dilation * (kw - 1) - 1) // stride + 1
    x_nhwc = x.transpose(0, 2, 3, 1)
    xp = jnp.pad(x_nhwc, ((0, 0), (padding, padding), (padding, padding), (0, 0)))
    taps = []
    for i in range(kh):
        for j in range(kw):
            hi, wj = i * dilation, j * dilation
            taps.append(
                xp[:, hi:hi + stride * (oh - 1) + 1:stride,
                      wj:wj + stride * (ow - 1) + 1:stride, :])   # (N, OH, OW, C)
    col = jnp.stack(taps, axis=3)                   # (N, OH, OW, KH*KW, C)
    col = col.reshape(n * oh * ow, kh * kw * c)     # contiguous, no transpose
    # TODO(synk): for a further ~KH*KW x HBM-traffic reduction, tile spatially
    # with halo'd NHWC blocks and do the KH*KW shifted matmuls inside the
    # kernel instead of materializing the im2col matrix in HBM.
    return col, oh, ow


@functools.partial(
    jax.jit,
    static_argnames=("stride", "padding", "dilation", "block_m", "matmul_dtype"))
def conv2d_batchnorm_relu(x, weight, bias, gamma, beta, *, stride, padding,
                          dilation=1, block_m=1024, matmul_dtype=jnp.float32):
    """Fused Conv2d + BatchNorm2d(training batch stats) + ReLU.

    x: (N, Cin, H, W) NCHW.  weight: (Cout, Cin, KH, KW) OIHW.
    `bias` is accepted for API parity but not applied: with training-mode BN
    the per-channel conv bias is exactly cancelled by the mean subtraction.
    """
    del bias  # mathematically a no-op under BN; removes one DMA stream + VPU add
    n = x.shape[0]
    cout, cin, kh, kw = weight.shape

    col, oh, ow = _im2col_nhwc(x, kh, kw, stride, padding, dilation)  # (M, K)
    m, k = col.shape

    # Weight to (KH, KW, Cin, Cout) -> (K, Cout), matching im2col column order.
    w2d = weight.transpose(2, 3, 1, 0).reshape(k, cout)

    # --- lane-dense / tile-aligned padding (zeros => exact no-op) -----------
    cout_pad = _round_up(cout, 128)
    tk = min(512, _round_up(k, 128))
    k_pad = _round_up(k, tk)
    tm = min(block_m, _round_up(m, 8))
    m_pad = _round_up(m, tm)
    num_m = m_pad // tm
    num_k = k_pad // tk

    col = jnp.pad(col.astype(matmul_dtype), ((0, m_pad - m), (0, k_pad - k)))
    w2d = jnp.pad(w2d.astype(matmul_dtype), ((0, k_pad - k), (0, cout_pad - cout)))

    in_item = jnp.dtype(matmul_dtype).itemsize

    # --- phase 1: conv + per-tile partial BN stats ---------------------------
    fp1 = (2 * (tm * tk * in_item + tk * cout_pad * in_item
                + tm * cout_pad * 4 + 2 * cout_pad * 4)
           + tm * cout_pad * 4)                       # double-buffers + acc scratch
    vmem1 = int(min(max(2 * fp1 + (4 << 20), 32 << 20), 60 << 20))
    bytes1 = (m_pad * k_pad * in_item + k_pad * cout_pad * in_item
              + m_pad * cout_pad * 4 + num_m * 2 * cout_pad * 4)

    conv_out, stats = pl.pallas_call(
        _conv_stats_kernel,
        out_shape=(
            jax.ShapeDtypeStruct((m_pad, cout_pad), jnp.float32),
            jax.ShapeDtypeStruct((num_m, 2, cout_pad), jnp.float32),
        ),
        grid_spec=pltpu.PrefetchScalarGridSpec(
            num_scalar_prefetch=0,
            grid=(num_m, num_k),
            in_specs=[
                pl.BlockSpec((tm, tk), lambda i, kk: (i, kk)),
                pl.BlockSpec((tk, cout_pad), lambda i, kk: (kk, 0)),
            ],
            out_specs=[
                pl.BlockSpec((tm, cout_pad), lambda i, kk: (i, 0)),
                pl.BlockSpec((1, 2, cout_pad), lambda i, kk: (i, 0, 0)),
            ],
            scratch_shapes=[pltpu.VMEM((tm, cout_pad), jnp.float32)],
        ),
        compiler_params=pltpu.CompilerParams(
            dimension_semantics=("parallel", "arbitrary"),
            vmem_limit_bytes=vmem1),
        cost_estimate=pl.CostEstimate(
            flops=2 * m_pad * k_pad * cout_pad,
            transcendentals=0,
            bytes_accessed=bytes1),
    )(col, w2d)

    # --- tiny cross-tile stat combine (O(Cout) work, plain JAX) --------------
    sums = jnp.sum(stats[:, 0, :], axis=0)            # (Cout_pad,)
    sumsq = jnp.sum(stats[:, 1, :], axis=0)
    inv_m = 1.0 / float(m)                            # true M (padded rows are 0)
    mean = sums * inv_m
    var = jnp.maximum(sumsq * inv_m - mean * mean, 0.0)   # biased variance
    inv_std = jax.lax.rsqrt(var + BN_EPS)
    gamma_p = jnp.pad(gamma.astype(jnp.float32), (0, cout_pad - cout))
    beta_p = jnp.pad(beta.astype(jnp.float32), (0, cout_pad - cout))
    scale = (gamma_p * inv_std).reshape(1, cout_pad)
    shift = (beta_p - mean * gamma_p * inv_std).reshape(1, cout_pad)

    # --- phase 2: normalize + ReLU -------------------------------------------
    fp2 = 2 * (2 * tm * cout_pad * 4 + 2 * cout_pad * 4)
    vmem2 = int(min(max(2 * fp2 + (4 << 20), 32 << 20), 60 << 20))
    bytes2 = 2 * m_pad * cout_pad * 4 + 2 * cout_pad * 4

    out = pl.pallas_call(
        _bn_relu_kernel,
        out_shape=jax.ShapeDtypeStruct((m_pad, cout_pad), jnp.float32),
        grid=(num_m,),
        in_specs=[
            pl.BlockSpec((tm, cout_pad), lambda i: (i, 0)),
            pl.BlockSpec((1, cout_pad), lambda i: (0, 0)),
            pl.BlockSpec((1, cout_pad), lambda i: (0, 0)),
        ],
        out_specs=pl.BlockSpec((tm, cout_pad), lambda i: (i, 0)),
        compiler_params=pltpu.CompilerParams(
            dimension_semantics=("parallel",),
            vmem_limit_bytes=vmem2),
        cost_estimate=pl.CostEstimate(
            flops=2 * m_pad * cout_pad,
            transcendentals=0,
            bytes_accessed=bytes2),
    )(conv_out, scale, shift)

    # (M_pad, Cout_pad) -> (N, Cout, OH, OW)
    out = out[:m, :cout].reshape(n, oh, ow, cout).transpose(0, 3, 1, 2)
    return out


def _reference(x, weight, bias, gamma, beta, *, stride, padding, dilation):
    conv = jax.lax.conv_general_dilated(
        x, weight, window_strides=(stride, stride),
        padding=[(padding, padding), (padding, padding)],
        rhs_dilation=(dilation, dilation),
        dimension_numbers=("NCHW", "OIHW", "NCHW"))
    conv = conv + bias.reshape(1, -1, 1, 1)
    mean = conv.mean(axis=(0, 2, 3), keepdims=True)
    var = conv.var(axis=(0, 2, 3), keepdims=True)        # biased, BN training mode
    y = (conv - mean) / jnp.sqrt(var + BN_EPS)
    y = y * gamma.reshape(1, -1, 1, 1) + beta.reshape(1, -1, 1, 1)
    return jnp.maximum(y, 0.0)


if __name__ == "__main__":
    # Module config: conv2DBatchNormRelu(in_channels=4, n_filters=8, k_size=3,
    #                                    stride=1, padding=1, bias=True,
    #                                    dilation=1, is_batchnorm=True)
    in_channels, n_filters, k_size, stride, padding, dilation = 4, 8, 3, 1, 1, 1
    N, H, W = 2, 16, 16

    key = jax.random.PRNGKey(0)
    kx, kw_, kb, kg, kbt = jax.random.split(key, 5)
    x = jax.random.normal(kx, (N, in_channels, H, W), dtype=jnp.float32)
    weight = jax.random.normal(kw_, (n_filters, in_channels, k_size, k_size),
                               dtype=jnp.float32) * 0.1
    bias = jax.random.normal(kb, (n_filters,), dtype=jnp.float32) * 0.1
    gamma = 1.0 + 0.1 * jax.random.normal(kg, (n_filters,), dtype=jnp.float32)
    beta = 0.1 * jax.random.normal(kbt, (n_filters,), dtype=jnp.float32)

    # block_m=256 so the demo (M = 2*16*16 = 512 rows) exercises the multi-tile
    # grid and the cross-tile BN-statistics combine; use 512-2048 at real sizes.
    out = conv2d_batchnorm_relu(x, weight, bias, gamma, beta,
                                stride=stride, padding=padding,
                                dilation=dilation, block_m=256)
    out = jax.block_until_ready(out)

    ref = _reference(x, weight, bias, gamma, beta,
                     stride=stride, padding=padding, dilation=dilation)
    assert out.shape == (N, n_filters, H, W)
    assert jnp.allclose(out, ref, atol=1e-4, rtol=1e-4), "mismatch vs reference"

    print("KERNEL_OK")
</pallas_src>

<mosaic_0001>
module attributes {stable_mosaic.version = 11 : i64} {
  func.func @_conv_stats_kernel(%arg0: i32, %arg1: i32, %arg2: memref<256x128xf32, #tpu.memory_space<vmem>>, %arg3: memref<128x128xf32, #tpu.memory_space<vmem>>, %arg4: memref<256x128xf32, #tpu.memory_space<vmem>>, %arg5: memref<1x2x128xf32, #tpu.memory_space<vmem>>, %arg6: memref<256x128xf32, #tpu.memory_space<vmem>>) attributes {dimension_semantics = [#tpu.dimension_semantics<parallel>, #tpu.dimension_semantics<arbitrary>], iteration_bounds = array<i64: 2, 1>, scalar_prefetch = 0 : i64, scratch_operands = 1 : i64, tpu.core_type = #tpu.core_type<tc>, window_params = [{transform_indices = @transform_0, window_bounds = array<i64: 256, 128>}, {transform_indices = @transform_1, window_bounds = array<i64: 128, 128>}, {transform_indices = @transform_2, window_bounds = array<i64: 256, 128>}, {transform_indices = @transform_3, window_bounds = array<i64: 1, 2, 128>}]} {
    %c0_i32 = arith.constant 0 : i32
    %0 = arith.cmpi eq, %arg1, %c0_i32 : i32
    %1 = arith.extui %0 : i1 to i32
    %c0_i32_0 = arith.constant 0 : i32
    %2 = arith.cmpi ne, %1, %c0_i32_0 : i32
    scf.if %2 {
      %cst_10 = arith.constant 0.000000e+00 : f32
      %12 = vector.broadcast %cst_10 : f32 to vector<256x128xf32>
      %c0_11 = arith.constant 0 : index
      %c0_12 = arith.constant 0 : index
      %13 = vector.load %arg6[%c0_11, %c0_12] : memref<256x128xf32, #tpu.memory_space<vmem>>, vector<256x128xf32>
      tpu.vector_store %arg6[%c0_11, %c0_12], %12 {strides = array<i32>} : memref<256x128xf32, #tpu.memory_space<vmem>>, vector<256x128xf32>,
    } else {
    }
    %c0 = arith.constant 0 : index
    %c0_1 = arith.constant 0 : index
    %3 = vector.load %arg6[%c0, %c0_1] : memref<256x128xf32, #tpu.memory_space<vmem>>, vector<256x128xf32>
    %c0_2 = arith.constant 0 : index
    %c0_3 = arith.constant 0 : index
    %4 = vector.load %arg2[%c0_2, %c0_3] : memref<256x128xf32, #tpu.memory_space<vmem>>, vector<256x128xf32>
    %c0_4 = arith.constant 0 : index
    %c0_5 = arith.constant 0 : index
    %5 = vector.load %arg3[%c0_4, %c0_5] : memref<128x128xf32, #tpu.memory_space<vmem>>, vector<128x128xf32>
    %cst = arith.constant dense<0.000000e+00> : vector<256x128xf32>
    %6 = tpu.matmul %4, %5, %cst {dimension_numbers = #tpu.dot_dimension_numbers<[1], [0], [0], [1], [0, 0, 1, 1], [], []>} : vector<256x128xf32>, vector<128x128xf32>, vector<256x128xf32> -> vector<256x128xf32>
    %7 = arith.addf %3, %6 : vector<256x128xf32>
    %c0_6 = arith.constant 0 : index
    %c0_7 = arith.constant 0 : index
    %8 = vector.load %arg6[%c0_6, %c0_7] : memref<256x128xf32, #tpu.memory_space<vmem>>, vector<256x128xf32>
    tpu.vector_store %arg6[%c0_6, %c0_7], %7 {strides = array<i32>} : memref<256x128xf32, #tpu.memory_space<vmem>>, vector<256x128xf32>,
    %c0_i32_8 = arith.constant 0 : i32
    %9 = arith.cmpi eq, %arg1, %c0_i32_8 : i32
    %10 = arith.extui %9 : i1 to i32
    %c0_i32_9 = arith.constant 0 : i32
    %11 = arith.cmpi ne, %10, %c0_i32_9 : i32
    scf.if %11 {
      %c0_10 = arith.constant 0 : index
      %c0_11 = arith.constant 0 : index
      %12 = vector.load %arg6[%c0_10, %c0_11] : memref<256x128xf32, #tpu.memory_space<vmem>>, vector<256x128xf32>
      %c0_12 = arith.constant 0 : index
      %c0_13 = arith.constant 0 : index
      %13 = vector.load %arg4[%c0_12, %c0_13] : memref<256x128xf32, #tpu.memory_space<vmem>>, vector<256x128xf32>
      tpu.vector_store %arg4[%c0_12, %c0_13], %12 {strides = array<i32>} : memref<256x128xf32, #tpu.memory_space<vmem>>, vector<256x128xf32>,
      %cst_14 = arith.constant dense<0.000000e+00> : vector<128xf32>
      %14 = vector.multi_reduction <add>, %12, %cst_14 [0] : vector<256x128xf32> to vector<128xf32>
      %15 = vector.shape_cast %14 : vector<128xf32> to vector<1x128xf32>
      %16 = arith.mulf %12, %12 : vector<256x128xf32>
      %cst_15 = arith.constant dense<0.000000e+00> : vector<128xf32>
      %17 = vector.multi_reduction <add>, %16, %cst_15 [0] : vector<256x128xf32> to vector<128xf32>
      %18 = vector.shape_cast %17 : vector<128xf32> to vector<1x128xf32>
      %19 = tpu.concatenate %15, %18 in 0 : vector<1x128xf32>, vector<1x128xf32> -> vector<2x128xf32>
      %20 = vector.shape_cast %19 : vector<2x128xf32> to vector<1x2x128xf32>
      %c0_16 = arith.constant 0 : index
      %c0_17 = arith.constant 0 : index
      %c0_18 = arith.constant 0 : index
      %21 = vector.load %arg5[%c0_16, %c0_17, %c0_18] : memref<1x2x128xf32, #tpu.memory_space<vmem>>, vector<1x2x128xf32>
      tpu.vector_store %arg5[%c0_16, %c0_17, %c0_18], %20 {strides = array<i32>} : memref<1x2x128xf32, #tpu.memory_space<vmem>>, vector<1x2x128xf32>,
    } else {
    }
    return
  }
  func.func @transform_0(%arg0: i32, %arg1: i32) -> (i32, i32) {
    %c0_i32 = arith.constant 0 : i32
    return %arg0, %arg1 : i32, i32
  }
  func.func @transform_1(%arg0: i32, %arg1: i32) -> (i32, i32) {
    %c0_i32 = arith.constant 0 : i32
    %c0_i32_0 = arith.constant 0 : i32
    return %arg1, %c0_i32 : i32, i32
  }
  func.func @transform_2(%arg0: i32, %arg1: i32) -> (i32, i32) {
    %c0_i32 = arith.constant 0 : i32
    %c0_i32_0 = arith.constant 0 : i32
    return %arg0, %c0_i32 : i32, i32
  }
  func.func @transform_3(%arg0: i32, %arg1: i32) -> (i32, i32, i32) {
    %c0_i32 = arith.constant 0 : i32
    %c0_i32_0 = arith.constant 0 : i32
    %c0_i32_1 = arith.constant 0 : i32
    return %arg0, %c0_i32, %c0_i32_0 : i32, i32, i32
  }
}

module attributes {stable_mosaic.version = 11 : i64} {
  func.func @_bn_relu_kernel(%arg0: i32, %arg1: memref<256x128xf32, #tpu.memory_space<vmem>>, %arg2: memref<1x128xf32, #tpu.memory_space<vmem>>, %arg3: memref<1x128xf32, #tpu.memory_space<vmem>>, %arg4: memref<256x128xf32, #tpu.memory_space<vmem>>) attributes {dimension_semantics = [#tpu.dimension_semantics<parallel>], iteration_bounds = array<i64: 2>, scalar_prefetch = 0 : i64, scratch_operands = 0 : i64, tpu.core_type = #tpu.core_type<tc>, window_params = [{transform_indices = @transform_0, window_bounds = array<i64: 256, 128>}, {pipeline_mode = #tpu.pipeline_mode<synchronous>, transform_indices = @transform_1, window_bounds = array<i64: 1, 128>}, {pipeline_mode = #tpu.pipeline_mode<synchronous>, transform_indices = @transform_2, window_bounds = array<i64: 1, 128>}, {transform_indices = @transform_3, window_bounds = array<i64: 256, 128>}]} {
    %c0 = arith.constant 0 : index
    %c0_0 = arith.constant 0 : index
    %0 = vector.load %arg1[%c0, %c0_0] : memref<256x128xf32, #tpu.memory_space<vmem>>, vector<256x128xf32>
    %c0_1 = arith.constant 0 : index
    %c0_2 = arith.constant 0 : index
    %1 = vector.load %arg2[%c0_1, %c0_2] : memref<1x128xf32, #tpu.memory_space<vmem>>, vector<1x128xf32>
    %2 = vector.broadcast %1 : vector<1x128xf32> to vector<256x128xf32>
    %3 = arith.mulf %0, %2 : vector<256x128xf32>
    %c0_3 = arith.constant 0 : index
    %c0_4 = arith.constant 0 : index
    %4 = vector.load %arg3[%c0_3, %c0_4] : memref<1x128xf32, #tpu.memory_space<vmem>>, vector<1x128xf32>
    %5 = vector.broadcast %4 : vector<1x128xf32> to vector<256x128xf32>
    %6 = arith.addf %3, %5 : vector<256x128xf32>
    %cst = arith.constant 0.000000e+00 : f32
    %7 = vector.broadcast %cst : f32 to vector<256x128xf32>
    %8 = arith.maximumf %6, %7 : vector<256x128xf32>
    %c0_5 = arith.constant 0 : index
    %c0_6 = arith.constant 0 : index
    %9 = vector.load %arg4[%c0_5, %c0_6] : memref<256x128xf32, #tpu.memory_space<vmem>>, vector<256x128xf32>
    tpu.vector_store %arg4[%c0_5, %c0_6], %8 {strides = array<i32>} : memref<256x128xf32, #tpu.memory_space<vmem>>, vector<256x128xf32>,
    return
  }
  func.func @transform_0(%arg0: i32) -> (i32, i32) {
    %c0_i32 = arith.constant 0 : i32
    %c0_i32_0 = arith.constant 0 : i32
    return %arg0, %c0_i32 : i32, i32
  }
  func.func @transform_1(%arg0: i32) -> (i32, i32) {
    %c0_i32 = arith.constant 0 : i32
    %c0_i32_0 = arith.constant 0 : i32
    %c0_i32_1 = arith.constant 0 : i32
    return %c0_i32, %c0_i32_0 : i32, i32
  }
  func.func @transform_2(%arg0: i32) -> (i32, i32) {
    %c0_i32 = arith.constant 0 : i32
    %c0_i32_0 = arith.constant 0 : i32
    %c0_i32_1 = arith.constant 0 : i32
    return %c0_i32, %c0_i32_0 : i32, i32
  }
  func.func @transform_3(%arg0: i32) -> (i32, i32) {
    %c0_i32 = arith.constant 0 : i32
    %c0_i32_0 = arith.constant 0 : i32
    return %arg0, %c0_i32 : i32, i32
  }
}

</mosaic_0001>

<bundles_post_ra>
// kernel: conv2d_batchnorm_relu.3
= control target key start
LH: loop header
LB: loop body
LE: loop exit
PB: predicated region body
PF: predicated region fallthrough
CT: control target
= control target key end

     0   :  { %s453_s12 = smov 0   ;;  %s612_s0 = inlined_call_operand.vmem [shape: f32[512,128], index: 0, kind: input, shape index: {}]   ;;  %s613_s1 = inlined_call_operand.vmem [shape: f32[1,128], index: 1, kind: input, shape index: {}]   ;;  %s614_s2 = inlined_call_operand.vmem [shape: f32[1,128], index: 2, kind: input, shape index: {}]   ;;  %s615_s3 = inlined_call_operand.vmem [shape: f32[512,128], index: 3, kind: output, shape index: {}]  }
   0x1 LB: > { %s404_s13 = sadd.s32 4294967295, %s431_s12   ;;  %p408_p0 = scmp.ge.s32.totalorder %s431_s12, 1  ;;  %s431_s12 = sphi %s453_s12, %s13_s12  }
   0x2   : > { %p138_p1 = scmp.lt.s32.totalorder %s431_s12, 3 }
   0x4   : > { %p139_p2 = pnand %p408_p0, %p138_p1 }
   0x5   : > { %s409_s14 = sshll.u32 (!%p139_p2), %s404_s13, 5  ;;  %v464_v0 = vld [vmem:[%s613_s1] ss:$0 sm:$0xff] (!%p139_p2) }
   0x6   : > { %142 = sbr.rel (%p139_p2) target bundleno = 46 (0x2e), region = 32  ;;  %p163_p3 = scmp.lt.s32.totalorder (!%p139_p2), %s409_s14, 63  ;;  %v474_v1 = vld [vmem:[%s614_s2] ss:$0 sm:$0xff] (!%p139_p2) }
   0xd   : > { %s617_s14 = smov (!%p163_p3, %s409_s14), 63 }
   0xe   : > { %s410_s15 = sshll.u32 %s617_s14, 3 }
   0xf   : > { %s469_s20 = scalar_lea.vmem %s612_s0, %s410_s15  ;;  %s497_s25 = scalar_lea.vmem %s615_s3, %s410_s15 }
  0x10   : > { %v174_v2 = vld [vmem:[%s469_s20] sm:$0xff]  ;;  %v175_v3 = vld [vmem:[%s469_s20 + $0x8] sm:$0xff]  ;;  %v176_v4 = vld [vmem:[%s469_s20 + $0x10] sm:$0xff] }
  0x11   : > { %v213_v5 = vmul.f32 %v464_v0, %v174_v2  ;;  %v214_v6 = vmul.f32 %v464_v0, %v175_v3  ;;  %v215_v7 = vmul.f32 %v464_v0, %v176_v4  ;;  %v177_v8 = vld [vmem:[%s469_s20 + $0x18] sm:$0xff]  ;;  %v178_v9 = vld [vmem:[%s469_s20 + $0x20] sm:$0xff]  ;;  %v179_v10 = vld [vmem:[%s469_s20 + $0x28] sm:$0xff] }
  0x12   : > { %v216_v11 = vmul.f32 %v464_v0, %v177_v8  ;;  %v217_v12 = vmul.f32 %v464_v0, %v178_v9  ;;  %v218_v13 = vmul.f32 %v464_v0, %v179_v10  ;;  %v180_v14 = vld [vmem:[%s469_s20 + $0x30] sm:$0xff]  ;;  %v181_v15 = vld [vmem:[%s469_s20 + $0x38] sm:$0xff]  ;;  %v182_v24 = vld [vmem:[%s469_s20 + $0x40] sm:$0xff] }
  0x13   : > { %v252_v16 = vadd.f32 %v474_v1, %v213_v5  ;;  %v253_v17 = vadd.f32 %v474_v1, %v214_v6  ;;  %v254_v18 = vadd.f32 %v474_v1, %v215_v7  ;;  %v219_v19 = vmul.f32 %v464_v0, %v180_v14  ;;  %v183_v25 = vld [vmem:[%s469_s20 + $0x48] sm:$0xff]  ;;  %v184_v26 = vld [vmem:[%s469_s20 + $0x50] sm:$0xff]  ;;  %v185_v31 = vld [vmem:[%s469_s20 + $0x58] sm:$0xff] }
  0x14   : > { %v255_v20 = vadd.f32 %v474_v1, %v216_v11  ;;  %v256_v21 = vadd.f32 %v474_v1, %v217_v12  ;;  %v257_v22 = vadd.f32 %v474_v1, %v218_v13  ;;  %v220_v23 = vmul.f32 %v464_v0, %v181_v15  ;;  %v186_v32 = vld [vmem:[%s469_s20 + $0x60] sm:$0xff]  ;;  %v187_v33 = vld [vmem:[%s469_s20 + $0x68] sm:$0xff]  ;;  %v188_v38 = vld [vmem:[%s469_s20 + $0x70] sm:$0xff] }
  0x15   : > { %v284_v27 = vmax.f32 %v252_v16, 0.0  ;;  %v285_v28 = vmax.f32 %v253_v17, 0.0  ;;  %v286_v29 = vmax.f32 %v254_v18, 0.0  ;;  %v258_v30 = vadd.f32 %v474_v1, %v219_v19  ;;  %v189_v43 = vld [vmem:[%s469_s20 + $0x78] sm:$0xff]  ;;  %v190_v56 = vld [vmem:[%s469_s20 + $0x80] sm:$0xff]  ;;  %v191_v57 = vld [vmem:[%s469_s20 + $0x88] sm:$0xff] }
  0x16   : > { %v287_v34 = vmax.f32 %v255_v20, 0.0  ;;  %v288_v35 = vmax.f32 %v256_v21, 0.0  ;;  %v289_v36 = vmax.f32 %v257_v22, 0.0  ;;  %v259_v37 = vadd.f32 %v474_v1, %v220_v23  ;;  %v192_v58 = vld [vmem:[%s469_s20 + $0x90] sm:$0xff]  ;;  %v193_v63 = vld [vmem:[%s469_s20 + $0x98] sm:$0xff]  ;;  %v194_v2 = vld [vmem:[%s469_s20 + $0xa0] sm:$0xff] }
  0x17   : > { %316 = vst [vmem:[%s497_s25] sm:$0xff] %v284_v27  ;;  %317 = vst [vmem:[%s497_s25 + $0x8] sm:$0xff] %v285_v28  ;;  %v290_v39 = vmax.f32 %v258_v30, 0.0  ;;  %v221_v40 = vmul.f32 %v464_v0, %v182_v24  ;;  %v222_v41 = vmul.f32 %v464_v0, %v183_v25  ;;  %v223_v42 = vmul.f32 %v464_v0, %v184_v26  ;;  %v195_v3 = vld [vmem:[%s469_s20 + $0xa8] sm:$0xff]  ;;  %v196_v8 = vld [vmem:[%s469_s20 + $0xb0] sm:$0xff] }
  0x18   : > { %318 = vst [vmem:[%s497_s25 + $0x10] sm:$0xff] %v286_v29  ;;  %319 = vst [vmem:[%s497_s25 + $0x18] sm:$0xff] %v287_v34  ;;  %v291_v44 = vmax.f32 %v259_v37, 0.0  ;;  %v224_v45 = vmul.f32 %v464_v0, %v185_v31  ;;  %v225_v46 = vmul.f32 %v464_v0, %v186_v32  ;;  %v226_v47 = vmul.f32 %v464_v0, %v187_v33  ;;  %v197_v13 = vld [vmem:[%s469_s20 + $0xb8] sm:$0xff]  ;;  %v198_v26 = vld [vmem:[%s469_s20 + $0xc0] sm:$0xff] }
  0x19   : > { %320 = vst [vmem:[%s497_s25 + $0x20] sm:$0xff] %v288_v35  ;;  %321 = vst [vmem:[%s497_s25 + $0x28] sm:$0xff] %v289_v36  ;;  %v260_v48 = vadd.f32 %v474_v1, %v221_v40  ;;  %v261_v49 = vadd.f32 %v474_v1, %v222_v41  ;;  %v262_v50 = vadd.f32 %v474_v1, %v223_v42  ;;  %v199_v27 = vld [vmem:[%s469_s20 + $0xc8] sm:$0xff]  ;;  %v200_v28 = vld [vmem:[%s469_s20 + $0xd0] sm:$0xff] }
  0x1a   : > { %322 = vst [vmem:[%s497_s25 + $0x30] sm:$0xff] %v290_v39  ;;  %v227_v51 = vmul.f32 %v464_v0, %v188_v38  ;;  %323 = vst [vmem:[%s497_s25 + $0x38] sm:$0xff] %v291_v44  ;;  %v263_v52 = vadd.f32 %v474_v1, %v224_v45  ;;  %v264_v53 = vadd.f32 %v474_v1, %v225_v46  ;;  %v201_v33 = vld [vmem:[%s469_s20 + $0xd8] sm:$0xff]  ;;  %v202_v34 = vld [vmem:[%s469_s20 + $0xe0] sm:$0xff] }
  0x1b   : > { %v265_v54 = vadd.f32 %v474_v1, %v226_v47  ;;  %v228_v55 = vmul.f32 %v464_v0, %v189_v43  ;;  %v292_v59 = vmax.f32 %v260_v48, 0.0  ;;  %v293_v60 = vmax.f32 %v261_v49, 0.0  ;;  %v203_v35 = vld [vmem:[%s469_s20 + $0xe8] sm:$0xff]  ;;  %v204_v40 = vld [vmem:[%s469_s20 + $0xf0] sm:$0xff]  ;;  %v205_v45 = vld [vmem:[%s469_s20 + $0xf8] sm:$0xff] }
  0x1c   : > { %v294_v61 = vmax.f32 %v262_v50, 0.0  ;;  %v266_v62 = vadd.f32 %v474_v1, %v227_v51  ;;  %v295_v4 = vmax.f32 %v263_v52, 0.0  ;;  %v296_v5 = vmax.f32 %v264_v53, 0.0 }
  0x1d   : > { %v297_v6 = vmax.f32 %v265_v54, 0.0  ;;  %v267_v7 = vadd.f32 %v474_v1, %v228_v55  ;;  %324 = vst [vmem:[%s497_s25 + $0x40] sm:$0xff] %v292_v59  ;;  %325 = vst [vmem:[%s497_s25 + $0x48] sm:$0xff] %v293_v60  ;;  %v229_v10 = vmul.f32 %v464_v0, %v190_v56  ;;  %v230_v11 = vmul.f32 %v464_v0, %v191_v57 }
  0x1e   : > { %326 = vst [vmem:[%s497_s25 + $0x50] sm:$0xff] %v294_v61  ;;  %v298_v9 = vmax.f32 %v266_v62, 0.0  ;;  %v231_v12 = vmul.f32 %v464_v0, %v192_v58  ;;  %327 = vst [vmem:[%s497_s25 + $0x58] sm:$0xff] %v295_v4  ;;  %v232_v15 = vmul.f32 %v464_v0, %v193_v63  ;;  %v233_v16 = vmul.f32 %v464_v0, %v194_v2 }
  0x1f   : > { %328 = vst [vmem:[%s497_s25 + $0x60] sm:$0xff] %v296_v5  ;;  %329 = vst [vmem:[%s497_s25 + $0x68] sm:$0xff] %v297_v6  ;;  %v299_v14 = vmax.f32 %v267_v7, 0.0  ;;  %v234_v17 = vmul.f32 %v464_v0, %v195_v3  ;;  %v268_v18 = vadd.f32 %v474_v1, %v229_v10  ;;  %v269_v19 = vadd.f32 %v474_v1, %v230_v11 }
  0x20   : > { %330 = vst [vmem:[%s497_s25 + $0x70] sm:$0xff] %v298_v9  ;;  %v270_v20 = vadd.f32 %v474_v1, %v231_v12  ;;  %v235_v21 = vmul.f32 %v464_v0, %v196_v8  ;;  %v271_v22 = vadd.f32 %v474_v1, %v232_v15  ;;  %v272_v23 = vadd.f32 %v474_v1, %v233_v16 }
  0x21   : > { %331 = vst [vmem:[%s497_s25 + $0x78] sm:$0xff] %v299_v14  ;;  %v273_v24 = vadd.f32 %v474_v1, %v234_v17  ;;  %v236_v25 = vmul.f32 %v464_v0, %v197_v13  ;;  %v300_v29 = vmax.f32 %v268_v18, 0.0  ;;  %v301_v30 = vmax.f32 %v269_v19, 0.0 }
  0x22   : > { %v302_v31 = vmax.f32 %v270_v20, 0.0  ;;  %v274_v32 = vadd.f32 %v474_v1, %v235_v21  ;;  %v303_v36 = vmax.f32 %v271_v22, 0.0  ;;  %v304_v37 = vmax.f32 %v272_v23, 0.0 }
  0x23   : > { %v305_v38 = vmax.f32 %v273_v24, 0.0  ;;  %v275_v39 = vadd.f32 %v474_v1, %v236_v25  ;;  %332 = vst [vmem:[%s497_s25 + $0x80] sm:$0xff] %v300_v29  ;;  %333 = vst [vmem:[%s497_s25 + $0x88] sm:$0xff] %v301_v30  ;;  %v237_v42 = vmul.f32 %v464_v0, %v198_v26  ;;  %v238_v43 = vmul.f32 %v464_v0, %v199_v27 }
  0x24   : > { %334 = vst [vmem:[%s497_s25 + $0x90] sm:$0xff] %v302_v31  ;;  %v306_v41 = vmax.f32 %v274_v32, 0.0  ;;  %v239_v44 = vmul.f32 %v464_v0, %v200_v28  ;;  %335 = vst [vmem:[%s497_s25 + $0x98] sm:$0xff] %v303_v36  ;;  %v240_v47 = vmul.f32 %v464_v0, %v201_v33  ;;  %v241_v48 = vmul.f32 %v464_v0, %v202_v34 }
  0x25   : > { %336 = vst [vmem:[%s497_s25 + $0xa0] sm:$0xff] %v304_v37  ;;  %337 = vst [vmem:[%s497_s25 + $0xa8] sm:$0xff] %v305_v38  ;;  %v307_v46 = vmax.f32 %v275_v39, 0.0  ;;  %v242_v49 = vmul.f32 %v464_v0, %v203_v35  ;;  %v276_v50 = vadd.f32 %v474_v1, %v237_v42  ;;  %v277_v51 = vadd.f32 %v474_v1, %v238_v43 }
  0x26   : > { %338 = vst [vmem:[%s497_s25 + $0xb0] sm:$0xff] %v306_v41  ;;  %v278_v52 = vadd.f32 %v474_v1, %v239_v44  ;;  %v243_v53 = vmul.f32 %v464_v0, %v204_v40  ;;  %v279_v54 = vadd.f32 %v474_v1, %v240_v47  ;;  %v280_v55 = vadd.f32 %v474_v1, %v241_v48 }
  0x27   : > { %339 = vst [vmem:[%s497_s25 + $0xb8] sm:$0xff] %v307_v46  ;;  %v281_v56 = vadd.f32 %v474_v1, %v242_v49  ;;  %v244_v57 = vmul.f32 %v464_v0, %v205_v45  ;;  %v308_v58 = vmax.f32 %v276_v50, 0.0  ;;  %v309_v59 = vmax.f32 %v277_v51, 0.0 }
  0x28   : > { %v310_v60 = vmax.f32 %v278_v52, 0.0  ;;  %v282_v61 = vadd.f32 %v474_v1, %v243_v53  ;;  %v311_v62 = vmax.f32 %v279_v54, 0.0  ;;  %v312_v63 = vmax.f32 %v280_v55, 0.0 }
  0x29   : > { %v313_v2 = vmax.f32 %v281_v56, 0.0  ;;  %v283_v3 = vadd.f32 %v474_v1, %v244_v57  ;;  %340 = vst [vmem:[%s497_s25 + $0xc0] sm:$0xff] %v308_v58  ;;  %341 = vst [vmem:[%s497_s25 + $0xc8] sm:$0xff] %v309_v59 }
  0x2a   : > { %342 = vst [vmem:[%s497_s25 + $0xd0] sm:$0xff] %v310_v60  ;;  %v314_v4 = vmax.f32 %v282_v61, 0.0  ;;  %343 = vst [vmem:[%s497_s25 + $0xd8] sm:$0xff] %v311_v62 }
  0x2b   : > { %344 = vst [vmem:[%s497_s25 + $0xe0] sm:$0xff] %v312_v63  ;;  %345 = vst [vmem:[%s497_s25 + $0xe8] sm:$0xff] %v313_v2  ;;  %v315_v0 = vmax.f32 %v283_v3, 0.0 }
  0x2c   : > { %346 = vst [vmem:[%s497_s25 + $0xf0] sm:$0xff] %v314_v4 }
  0x2d   : > { %347 = vst [vmem:[%s497_s25 + $0xf8] sm:$0xff] %v315_v0 }
  0x2e PF: > { %s13_s12 = sadd.s32 1, %s431_s12  }
  0x2f   : > { %p10_p4 = scmp.ge.s32.totalorder %s13_s12, 4  }
  0x31   :  { %12 = sbr.rel (!%p10_p4) target bundleno = 1 (0x1), region = 62 }

// kernel: conv2d_batchnorm_relu.2
= control target key start
LH: loop header
LB: loop body
LE: loop exit
PB: predicated region body
PF: predicated region fallthrough
CT: control target
= control target key end

     0   :  { %s1182_s12 = smov 0   ;;  %s1184_s13 = smov 0   ;;  %s1424_s0 = inlined_call_operand.vmem [shape: f32[512,128], index: 0, kind: input, shape index: {}]   ;;  %s1425_s1 = inlined_call_operand.vmem [shape: f32[128,128], index: 1, kind: input, shape index: {}]   ;;  %s1426_s2 = inlined_call_operand.vmem [shape: f32[512,128], index: 2, kind: output, shape index: {0}]   ;;  %s1427_s3 = inlined_call_operand.vmem [shape: f32[2,2,128], index: 3, kind: output, shape index: {1}]  }
   0x1   :  { %s1186_s14 = smov 0  }
   0x2 LB: > { %s26_s15 = sadd.s32 1, %s1156_s13  ;;  %p930_p0 = scmp.ge.s32.totalorder %s1160_s14, 1  ;;  %s1160_s14 = sphi %s1186_s14, %s14_s14   ;;  %s1156_s13 = sphi %s1184_s13, %s1429_s13   ;;  %s1152_s12 = sphi %s1182_s12, %s1428_s12  }
   0x3   : > { %p28_p1 = scmp.ge.s32.totalorder %s26_s15, 2  ;;  %p169_p2 = scmp.lt.s32.totalorder %s1160_s14, 3 }
   0x5   : > { %s1431_s15 = smov (%p28_p1, %s26_s15), 0  ;;  %p170_p3 = pnand %p930_p0, %p169_p2 }
   0x6   : > { %v330_v0 = vld [vmem:[%s1425_s1] sm:$0xff] (!%p170_p3)  ;;  %v331_v1 = vld [vmem:[%s1425_s1 + $0x8] sm:$0xff] (!%p170_p3)  ;;  %v332_v2 = vld [vmem:[%s1425_s1 + $0x10] sm:$0xff] (!%p170_p3)  ;;  %s931_s22 = sshll.u32 (!%p170_p3), %s1152_s12, 5  ;;  %p226_p5 = scmp.lt.s32.totalorder (!%p170_p3), %s1152_s12, 1  ;;  %vm808_vm0 = vcmask (!%p170_p3), 1040384  }
   0x7   : > { %173 = sbr.rel (%p170_p3) target bundleno = 334 (0x14e), region = 28  ;;  %v1066_v3 = vpack.c.bf16 (!%p170_p3), %v331_v1, %v330_v0  ;;  %v333_v4 = vld [vmem:[%s1425_s1 + $0x18] sm:$0xff] (!%p170_p3)  ;;  %p206_p4 = scmp.lt.s32.totalorder (!%p170_p3), %s931_s22, 63  ;;  %v334_v6 = vld [vmem:[%s1425_s1 + $0x20] sm:$0xff] (!%p170_p3)  ;;  %v335_v7 = vld [vmem:[%s1425_s1 + $0x28] sm:$0xff] (!%p170_p3) }
   0x8   : > { %v1070_v5 = vpack.c.bf16 (!%p170_p3), %v333_v4, %v332_v2  ;;  %v1074_v8 = vpack.c.bf16 (!%p170_p3), %v335_v7, %v334_v6  ;;  %v336_v9 = vld [vmem:[%s1425_s1 + $0x30] sm:$0xff] (!%p170_p3)  ;;  %v337_v10 = vld [vmem:[%s1425_s1 + $0x38] sm:$0xff] (!%p170_p3)  ;;  %v338_v13 = vld [vmem:[%s1425_s1 + $0x40] sm:$0xff] (!%p170_p3) }
   0x9   : > { %1067 = vmatprep.subr.bf16.mxu0 (!%p170_p3), %v1066_v3  ;;  %1098 = vmatprep.subr.bf16.mxu1 (!%p170_p3), %v1066_v3  ;;  %v1078_v12 = vpack.c.bf16 (!%p170_p3), %v337_v10, %v336_v9  ;;  %v339_v14 = vld [vmem:[%s1425_s1 + $0x48] sm:$0xff] (!%p170_p3)  ;;  %v340_v17 = vld [vmem:[%s1425_s1 + $0x50] sm:$0xff] (!%p170_p3)  ;;  %v341_v18 = vld [vmem:[%s1425_s1 + $0x58] sm:$0xff] (!%p170_p3) }
   0xa   : > { %1069 = vmatpush3.bf16.msra.mxu0 (!%p170_p3), %v1066_v3  ;;  %1106 = vmatpush3.bf16.msra.mxu1 (!%p170_p3), %v1066_v3  ;;  %v1082_v16 = vpack.c.bf16 (!%p170_p3), %v339_v14, %v338_v13  ;;  %v1086_v19 = vpack.c.bf16 (!%p170_p3), %v341_v18, %v340_v17  ;;  %v342_v20 = vld [vmem:[%s1425_s1 + $0x60] sm:$0xff] (!%p170_p3)  ;;  %v343_v21 = vld [vmem:[%s1425_s1 + $0x68] sm:$0xff] (!%p170_p3)  ;;  %v344_v23 = vld [vmem:[%s1425_s1 + $0x70] sm:$0xff] (!%p170_p3) }
   0xb   : > { %1071 = vmatprep.subr.bf16.mxu0 (!%p170_p3), %v1070_v5  ;;  %1099 = vmatprep.subr.bf16.mxu1 (!%p170_p3), %v1070_v5  ;;  %v1090_v22 = vpack.c.bf16 (!%p170_p3), %v343_v21, %v342_v20  ;;  %v345_v24 = vld [vmem:[%s1425_s1 + $0x78] sm:$0xff] (!%p170_p3) }
   0xc   : > { %v1094_v25 = vpack.c.bf16 (!%p170_p3), %v345_v24, %v344_v23 }
   0xe   : > { %s1433_s22 = smov (!%p206_p4, %s931_s22), 63  ;;  %1073 = vmatpush3.bf16.msra.mxu0 %v1070_v5  ;;  %1107 = vmatpush3.bf16.msra.mxu1 %v1070_v5  ;;  %s1435_s12 = smov (!%p226_p5, %s1152_s12), 1 }
   0xf   : > { %s932_s29 = sshll.u32 %s1433_s22, 3  ;;  %1075 = vmatprep.subr.bf16.mxu0 %v1074_v8  ;;  %1100 = vmatprep.subr.bf16.mxu1 %v1074_v8  ;;  %s935_s22 = sshll.u32 %s1435_s12, 1 }
  0x10   : > { %s1235_s9 = scalar_lea.vmem %s1424_s0, %s932_s29  ;;  %s1298_s7 = scalar_lea.vmem %s1426_s2, %s932_s29 }
  0x11   : > { %v298_v11 = vld [vmem:[%s1235_s9] sm:$0xff]  ;;  %v299_v26 = vld [vmem:[%s1235_s9 + $0x8] sm:$0xff]  ;;  %v300_v27 = vld [vmem:[%s1235_s9 + $0x10] sm:$0xff] }
  0x12   : > { %1018 = vmatprep.mubr.f32.mxu0 %v298_v11  ;;  %1077 = vmatpush3.bf16.msra.mxu0 %v1074_v8  ;;  %v314_v15 = vld [vmem:[%s1235_s9 + $0x80] sm:$0xff]  ;;  %v315_v28 = vld [vmem:[%s1235_s9 + $0x88] sm:$0xff]  ;;  %v316_v29 = vld [vmem:[%s1235_s9 + $0x90] sm:$0xff] }
  0x13   : > { %1079 = vmatprep.subr.bf16.mxu0 %v1078_v12  ;;  %1108 = vmatpush3.bf16.msra.mxu1 %v1074_v8  ;;  %v301_v30 = vld [vmem:[%s1235_s9 + $0x18] sm:$0xff]  ;;  %v302_v31 = vld [vmem:[%s1235_s9 + $0x20] sm:$0xff]  ;;  %v303_v34 = vld [vmem:[%s1235_s9 + $0x28] sm:$0xff] }
  0x14   : > { %1101 = vmatprep.subr.bf16.mxu1 %v1078_v12  ;;  %1042 = vmatprep.mubr.f32.mxu1 %v314_v15  ;;  %v317_v32 = vld [vmem:[%s1235_s9 + $0x98] sm:$0xff]  ;;  %v318_v33 = vld [vmem:[%s1235_s9 + $0xa0] sm:$0xff]  ;;  %v304_v35 = vld [vmem:[%s1235_s9 + $0x30] sm:$0xff] }
  0x15   : > { %v319_v36 = vld [vmem:[%s1235_s9 + $0xa8] sm:$0xff]  ;;  %v320_v37 = vld [vmem:[%s1235_s9 + $0xb0] sm:$0xff]  ;;  %v305_v38 = vld [vmem:[%s1235_s9 + $0x38] sm:$0xff] }
  0x16   : > { %1081 = vmatpush3.bf16.msra.mxu0 %v1078_v12  ;;  %v306_v39 = vld [vmem:[%s1235_s9 + $0x40] sm:$0xff]  ;;  %v321_v40 = vld [vmem:[%s1235_s9 + $0xb8] sm:$0xff]  ;;  %v307_v42 = vld [vmem:[%s1235_s9 + $0x48] sm:$0xff] }
  0x17   : > { %1083 = vmatprep.subr.bf16.mxu0 %v1082_v16  ;;  %1109 = vmatpush3.bf16.msra.mxu1 %v1078_v12  ;;  %v322_v41 = vld [vmem:[%s1235_s9 + $0xc0] sm:$0xff]  ;;  %v308_v43 = vld [vmem:[%s1235_s9 + $0x50] sm:$0xff]  ;;  %v323_v44 = vld [vmem:[%s1235_s9 + $0xc8] sm:$0xff] }
  0x18   : > { %1102 = vmatprep.subr.bf16.mxu1 %v1082_v16  ;;  %v324_v45 = vld [vmem:[%s1235_s9 + $0xd0] sm:$0xff]  ;;  %v309_v46 = vld [vmem:[%s1235_s9 + $0x58] sm:$0xff]  ;;  %v310_v47 = vld [vmem:[%s1235_s9 + $0x60] sm:$0xff] }
  0x19   : > { %v325_v48 = vld [vmem:[%s1235_s9 + $0xd8] sm:$0xff]  ;;  %v326_v49 = vld [vmem:[%s1235_s9 + $0xe0] sm:$0xff]  ;;  %v311_v50 = vld [vmem:[%s1235_s9 + $0x68] sm:$0xff] }
  0x1a   : > { %1085 = vmatpush3.bf16.msra.mxu0 %v1082_v16  ;;  %v312_v51 = vld [vmem:[%s1235_s9 + $0x70] sm:$0xff]  ;;  %v327_v52 = vld [vmem:[%s1235_s9 + $0xe8] sm:$0xff]  ;;  %v313_v54 = vld [vmem:[%s1235_s9 + $0x78] sm:$0xff] }
  0x1b   : > { %1087 = vmatprep.subr.bf16.mxu0 %v1086_v19  ;;  %1110 = vmatpush3.bf16.msra.mxu1 %v1082_v16  ;;  %v328_v53 = vld [vmem:[%s1235_s9 + $0xf0] sm:$0xff]  ;;  %v329_v55 = vld [vmem:[%s1235_s9 + $0xf8] sm:$0xff]  ;;  %s229_s9 = scalar_lea.vmem %s1427_s3, %s935_s22 }
  0x1c   : > { %1103 = vmatprep.subr.bf16.mxu1 %v1086_v19 }
  0x1e   : > { %1089 = vmatpush3.bf16.msra.mxu0 %v1086_v19 }
  0x1f   : > { %1091 = vmatprep.subr.bf16.mxu0 %v1090_v22  ;;  %1111 = vmatpush3.bf16.msra.mxu1 %v1086_v19 }
  0x20   : > { %1104 = vmatprep.subr.bf16.mxu1 %v1090_v22 }
  0x22   : > { %1093 = vmatpush3.bf16.msra.mxu0 %v1090_v22 }
  0x23   : > { %1095 = vmatprep.subr.bf16.mxu0 %v1094_v25  ;;  %1112 = vmatpush3.bf16.msra.mxu1 %v1090_v22 }
  0x24   : > { %1105 = vmatprep.subr.bf16.mxu1 %v1094_v25 }
  0x26   : > { %1097 = vmatpush3.bf16.msra.mxu0 %v1094_v25 }
  0x27   : > { %1113 = vmatpush3.bf16.msra.mxu1 %v1094_v25 }
  0x29   : > { %1019 = vmatmul.mubr.f32.vlgmr.msra.gmra.mrb[0].mxu0 %v299_v26 }
  0x2a   : > { %1021 = vmatprep.mubr.f32.mxu0 %v300_v27  ;;  %1043 = vmatmul.mubr.f32.vlgmr.msra.gmra.mrb[0].mxu1 %v315_v28 }
  0x2b   : > { %1045 = vmatprep.mubr.f32.mxu1 %v316_v29 }
  0x2d   : > { %1022 = vmatmul.mubr.f32.gmra.mrb[2].mxu0 %v301_v30 }
  0x2e   : > { %1024 = vmatprep.mubr.f32.mxu0 %v302_v31  ;;  %1046 = vmatmul.mubr.f32.gmra.mrb[2].mxu1 %v317_v32 }
  0x2f   : > { %1048 = vmatprep.mubr.f32.mxu1 %v318_v33 }
  0x31   : > { %1025 = vmatmul.mubr.f32.gmra.mrb[4].mxu0 %v303_v34 }
  0x32   : > { %1027 = vmatprep.mubr.f32.mxu0 %v304_v35  ;;  %1049 = vmatmul.mubr.f32.gmra.mrb[4].mxu1 %v319_v36 }
  0x33   : > { %1051 = vmatprep.mubr.f32.mxu1 %v320_v37 }
  0x35   : > { %1028 = vmatmul.mubr.f32.gmra.mrb[6].mxu0 %v305_v38 }
  0x36   : > { %1030 = vmatprep.mubr.f32.mxu0 %v306_v39  ;;  %1052 = vmatmul.mubr.f32.gmra.mrb[6].mxu1 %v321_v40 }
  0x37   : > { %1054 = vmatprep.mubr.f32.mxu1 %v322_v41 }
  0x39   : > { %1031 = vmatmul.mubr.f32.gmra.mrb[8].mxu0 %v307_v42 }
  0x3a   : > { %1033 = vmatprep.mubr.f32.mxu0 %v308_v43  ;;  %1055 = vmatmul.mubr.f32.gmra.mrb[8].mxu1 %v323_v44 }
  0x3b   : > { %1057 = vmatprep.mubr.f32.mxu1 %v324_v45 }
  0x3d   : > { %1034 = vmatmul.mubr.f32.gmra.mrb[10].mxu0 %v309_v46 }
  0x3e   : > { %1036 = vmatprep.mubr.f32.mxu0 %v310_v47  ;;  %1058 = vmatmul.mubr.f32.gmra.mrb[10].mxu1 %v325_v48 }
  0x3f   : > { %1060 = vmatprep.mubr.f32.mxu1 %v326_v49 }
  0x41   : > { %1037 = vmatmul.mubr.f32.gmra.mrb[12].mxu0 %v311_v50 }
  0x42   : > { %1039 = vmatprep.mubr.f32.mxu0 %v312_v51  ;;  %1061 = vmatmul.mubr.f32.gmra.mrb[12].mxu1 %v327_v52 }
  0x43   : > { %1063 = vmatprep.mubr.f32.mxu1 %v328_v53 }
  0x45   : > { %1040 = vmatmul.mubr.f32.gmra.mrb[14].mxu0 %v313_v54 }
  0x46   : > { %1064 = vmatmul.mubr.f32.gmra.mrb[14].mxu1 %v329_v55 }
  0xfc   : > { %v1020_v56 = vpop.f32.mrb[0].mxu0 }
  0xfd   : > { %671 = vst [vmem:[%s1298_s7 + $0x8] sm:$0xff] %v1020_v56  ;;  %v740_v57 = vmul.f32 %v1020_v56, %v1020_v56  ;;  %v412_v58 = vpop.f32.mrb[1].mxu0  ;;  %v1301_v59 = vpop.f32.mrb[0].mxu1 }
  0xfe   : > { %670 = vst [vmem:[%s1298_s7] sm:$0xff] %v412_v58  ;;  %v702_v60 = vadd.f32 %v1020_v56, %v412_v58  ;;  %v739_v61 = vmul.f32 %v412_v58, %v412_v58  ;;  %687 = vst [vmem:[%s1298_s7 + $0x88] sm:$0xff] %v1301_v59  ;;  %v1306_v62 = vpop.f32.mrb[1].mxu1 }
  0xff   : > { %686 = vst [vmem:[%s1298_s7 + $0x80] sm:$0xff] %v1306_v62 }
 0x100   : > { %v771_v63 = vadd.f32 %v740_v57, %v739_v61  ;;  %v1023_v0 = vpop.f32.mrb[2].mxu0 }
 0x101   : > { %673 = vst [vmem:[%s1298_s7 + $0x18] sm:$0xff] %v1023_v0  ;;  %v422_v1 = vpop.f32.mrb[3].mxu0  ;;  %v1311_v2 = vpop.f32.mrb[2].mxu1  ;;  %v742_v6 = vmul.f32 %v1023_v0, %v1023_v0 }
 0x102   : > { %672 = vst [vmem:[%s1298_s7 + $0x10] sm:$0xff] %v422_v1  ;;  %v703_v3 = vadd.f32 %v702_v60, %v422_v1  ;;  %v741_v4 = vmul.f32 %v422_v1, %v422_v1  ;;  %689 = vst [vmem:[%s1298_s7 + $0x98] sm:$0xff] %v1311_v2  ;;  %v1316_v5 = vpop.f32.mrb[3].mxu1 }
 0x103   : > { %688 = vst [vmem:[%s1298_s7 + $0x90] sm:$0xff] %v1316_v5 }
 0x104   : > { %v772_v7 = vadd.f32 %v771_v63, %v741_v4  ;;  %v1026_v8 = vpop.f32.mrb[4].mxu0  ;;  %v704_v9 = vadd.f32 %v1023_v0, %v703_v3 }
 0x105   : > { %675 = vst [vmem:[%s1298_s7 + $0x28] sm:$0xff] %v1026_v8  ;;  %v432_v10 = vpop.f32.mrb[5].mxu0  ;;  %v1321_v11 = vpop.f32.mrb[4].mxu1  ;;  %v744_v16 = vmul.f32 %v1026_v8, %v1026_v8 }
 0x106   : > { %674 = vst [vmem:[%s1298_s7 + $0x20] sm:$0xff] %v432_v10  ;;  %v705_v12 = vadd.f32 %v704_v9, %v432_v10  ;;  %v743_v13 = vmul.f32 %v432_v10, %v432_v10  ;;  %v773_v14 = vadd.f32 %v772_v7, %v742_v6  ;;  %691 = vst [vmem:[%s1298_s7 + $0xa8] sm:$0xff] %v1321_v11  ;;  %v1326_v15 = vpop.f32.mrb[5].mxu1 }
 0x107   : > { %690 = vst [vmem:[%s1298_s7 + $0xa0] sm:$0xff] %v1326_v15  ;;  %v755_v9 = vmul.f32 %v1306_v62, %v1306_v62 }
 0x108   : > { %v774_v17 = vadd.f32 %v773_v14, %v743_v13  ;;  %v1029_v18 = vpop.f32.mrb[6].mxu0  ;;  %v706_v19 = vadd.f32 %v1026_v8, %v705_v12  ;;  %v756_v13 = vmul.f32 %v1301_v59, %v1301_v59 }
 0x109   : > { %677 = vst [vmem:[%s1298_s7 + $0x38] sm:$0xff] %v1029_v18  ;;  %v442_v20 = vpop.f32.mrb[7].mxu0  ;;  %v1331_v21 = vpop.f32.mrb[6].mxu1  ;;  %v746_v26 = vmul.f32 %v1029_v18, %v1029_v18 }
 0x10a   : > { %676 = vst [vmem:[%s1298_s7 + $0x30] sm:$0xff] %v442_v20  ;;  %v707_v22 = vadd.f32 %v706_v19, %v442_v20  ;;  %v745_v23 = vmul.f32 %v442_v20, %v442_v20  ;;  %v775_v24 = vadd.f32 %v774_v17, %v744_v16  ;;  %693 = vst [vmem:[%s1298_s7 + $0xb8] sm:$0xff] %v1331_v21  ;;  %v1336_v25 = vpop.f32.mrb[7].mxu1 }
 0x10b   : > { %692 = vst [vmem:[%s1298_s7 + $0xb0] sm:$0xff] %v1336_v25  ;;  %v757_v17 = vmul.f32 %v1316_v5, %v1316_v5  ;;  %v758_v20 = vmul.f32 %v1311_v2, %v1311_v2 }
 0x10c   : > { %v776_v27 = vadd.f32 %v775_v24, %v745_v23  ;;  %v1032_v28 = vpop.f32.mrb[8].mxu0  ;;  %v708_v29 = vadd.f32 %v1029_v18, %v707_v22 }
 0x10d   : > { %679 = vst [vmem:[%s1298_s7 + $0x48] sm:$0xff] %v1032_v28  ;;  %v452_v30 = vpop.f32.mrb[9].mxu0  ;;  %v1341_v31 = vpop.f32.mrb[8].mxu1  ;;  %v748_v36 = vmul.f32 %v1032_v28, %v1032_v28 }
 0x10e   : > { %678 = vst [vmem:[%s1298_s7 + $0x40] sm:$0xff] %v452_v30  ;;  %v709_v32 = vadd.f32 %v708_v29, %v452_v30  ;;  %v747_v33 = vmul.f32 %v452_v30, %v452_v30  ;;  %v777_v34 = vadd.f32 %v776_v27, %v746_v26  ;;  %695 = vst [vmem:[%s1298_s7 + $0xc8] sm:$0xff] %v1341_v31  ;;  %v1346_v35 = vpop.f32.mrb[9].mxu1 }
 0x10f   : > { %694 = vst [vmem:[%s1298_s7 + $0xc0] sm:$0xff] %v1346_v35 }
 0x110   : > { %v778_v37 = vadd.f32 %v777_v34, %v747_v33  ;;  %v1035_v38 = vpop.f32.mrb[10].mxu0  ;;  %v710_v39 = vadd.f32 %v1032_v28, %v709_v32 }
 0x111   : > { %681 = vst [vmem:[%s1298_s7 + $0x58] sm:$0xff] %v1035_v38  ;;  %v462_v40 = vpop.f32.mrb[11].mxu0  ;;  %v1351_v41 = vpop.f32.mrb[10].mxu1  ;;  %v750_v46 = vmul.f32 %v1035_v38, %v1035_v38 }
 0x112   : > { %680 = vst [vmem:[%s1298_s7 + $0x50] sm:$0xff] %v462_v40  ;;  %v711_v42 = vadd.f32 %v710_v39, %v462_v40  ;;  %v749_v43 = vmul.f32 %v462_v40, %v462_v40  ;;  %v779_v44 = vadd.f32 %v778_v37, %v748_v36  ;;  %697 = vst [vmem:[%s1298_s7 + $0xd8] sm:$0xff] %v1351_v41  ;;  %v1356_v45 = vpop.f32.mrb[11].mxu1 }
 0x113   : > { %696 = vst [vmem:[%s1298_s7 + $0xd0] sm:$0xff] %v1356_v45 }
 0x114   : > { %v780_v47 = vadd.f32 %v779_v44, %v749_v43  ;;  %v1038_v48 = vpop.f32.mrb[12].mxu0  ;;  %v712_v49 = vadd.f32 %v1035_v38, %v711_v42 }
 0x115   : > { %683 = vst [vmem:[%s1298_s7 + $0x68] sm:$0xff] %v1038_v48  ;;  %v472_v50 = vpop.f32.mrb[13].mxu0  ;;  %v1361_v51 = vpop.f32.mrb[12].mxu1  ;;  %v752_v56 = vmul.f32 %v1038_v48, %v1038_v48 }
 0x116   : > { %682 = vst [vmem:[%s1298_s7 + $0x60] sm:$0xff] %v472_v50  ;;  %v713_v52 = vadd.f32 %v712_v49, %v472_v50  ;;  %v751_v53 = vmul.f32 %v472_v50, %v472_v50  ;;  %v781_v54 = vadd.f32 %v780_v47, %v750_v46  ;;  %699 = vst [vmem:[%s1298_s7 + $0xe8] sm:$0xff] %v1361_v51  ;;  %v552_v55 = vpop.f32.mrb[13].mxu1 }
 0x117   : > { %698 = vst [vmem:[%s1298_s7 + $0xe0] sm:$0xff] %v552_v55  ;;  %v767_v43 = vmul.f32 %v552_v55, %v552_v55  ;;  %v768_v47 = vmul.f32 %v1361_v51, %v1361_v51 }
 0x118   : > { %v782_v57 = vadd.f32 %v781_v54, %v751_v53  ;;  %v1041_v58 = vpop.f32.mrb[14].mxu0  ;;  %v714_v60 = vadd.f32 %v1038_v48, %v713_v52 }
 0x119   : > { %685 = vst [vmem:[%s1298_s7 + $0x78] sm:$0xff] %v1041_v58  ;;  %v482_v61 = vpop.f32.mrb[15].mxu0  ;;  %v1065_v63 = vpop.f32.mrb[14].mxu1  ;;  %v754_v6 = vmul.f32 %v1041_v58, %v1041_v58 }
 0x11a   : > { %684 = vst [vmem:[%s1298_s7 + $0x70] sm:$0xff] %v482_v61  ;;  %v715_v0 = vadd.f32 %v714_v60, %v482_v61  ;;  %v753_v1 = vmul.f32 %v482_v61, %v482_v61  ;;  %v783_v3 = vadd.f32 %v782_v57, %v752_v56  ;;  %701 = vst [vmem:[%s1298_s7 + $0xf8] sm:$0xff] %v1065_v63  ;;  %v562_v4 = vpop.f32.mrb[15].mxu1 }
 0x11b   : > { %700 = vst [vmem:[%s1298_s7 + $0xf0] sm:$0xff] %v562_v4  ;;  %v769_v49 = vmul.f32 %v562_v4, %v562_v4  ;;  %v770_v52 = vmul.f32 %v1065_v63, %v1065_v63 }
 0x11c   : > { %v716_v7 = vadd.f32 %v1041_v58, %v715_v0  ;;  %v784_v8 = vadd.f32 %v783_v3, %v753_v1 }
 0x11e   : > { %v785_v10 = vadd.f32 %v784_v8, %v754_v6  ;;  %v717_v12 = vadd.f32 %v716_v7, %v1306_v62  ;;  %v759_v62 = vmul.f32 %v1326_v15, %v1326_v15 }
 0x120   : > { %v786_v14 = vadd.f32 %v785_v10, %v755_v9  ;;  %v718_v16 = vadd.f32 %v1301_v59, %v717_v12  ;;  %v760_v59 = vmul.f32 %v1321_v11, %v1321_v11 }
 0x122   : > { %v719_v18 = vadd.f32 %v718_v16, %v1316_v5  ;;  %v787_v19 = vadd.f32 %v786_v14, %v756_v13  ;;  %v761_v5 = vmul.f32 %v1336_v25, %v1336_v25 }
 0x124   : > { %v788_v22 = vadd.f32 %v787_v19, %v757_v17  ;;  %v720_v23 = vadd.f32 %v1311_v2, %v719_v18  ;;  %v762_v2 = vmul.f32 %v1331_v21, %v1331_v21 }
 0x126   : > { %v721_v24 = vadd.f32 %v720_v23, %v1326_v15  ;;  %v789_v26 = vadd.f32 %v788_v22, %v758_v20  ;;  %v763_v15 = vmul.f32 %v1346_v35, %v1346_v35 }
 0x128   : > { %v790_v27 = vadd.f32 %v789_v26, %v759_v62  ;;  %v722_v28 = vadd.f32 %v1321_v11, %v721_v24  ;;  %v764_v11 = vmul.f32 %v1341_v31, %v1341_v31 }
 0x12a   : > { %v723_v29 = vadd.f32 %v722_v28, %v1336_v25  ;;  %v791_v30 = vadd.f32 %v790_v27, %v760_v59  ;;  %v765_v25 = vmul.f32 %v1356_v45, %v1356_v45 }
 0x12c   : > { %v792_v32 = vadd.f32 %v791_v30, %v761_v5  ;;  %v724_v33 = vadd.f32 %v1331_v21, %v723_v29  ;;  %v766_v21 = vmul.f32 %v1351_v41, %v1351_v41 }
 0x12e   : > { %v725_v34 = vadd.f32 %v724_v33, %v1346_v35  ;;  %v793_v36 = vadd.f32 %v792_v32, %v762_v2 }
 0x130   : > { %v794_v37 = vadd.f32 %v793_v36, %v763_v15  ;;  %v726_v38 = vadd.f32 %v1341_v31, %v725_v34 }
 0x132   : > { %v727_v39 = vadd.f32 %v726_v38, %v1356_v45  ;;  %v795_v40 = vadd.f32 %v794_v37, %v764_v11 }
 0x134   : > { %v796_v42 = vadd.f32 %v795_v40, %v765_v25  ;;  %v728_v35 = vadd.f32 %v1351_v41, %v727_v39 }
 0x136   : > { %v729_v44 = vadd.f32 %v728_v35, %v552_v55  ;;  %v797_v46 = vadd.f32 %v796_v42, %v766_v21 }
 0x138   : > { %v798_v31 = vadd.f32 %v797_v46, %v767_v43  ;;  %v730_v48 = vadd.f32 %v1361_v51, %v729_v44 }
 0x13a   : > { %v731_v45 = vadd.f32 %v730_v48, %v562_v4  ;;  %v799_v50 = vadd.f32 %v798_v31, %v768_v47 }
 0x13c   : > { %v732_v53 = vadd.f32 %v1065_v63, %v731_v45  ;;  %v800_v54 = vadd.f32 %v799_v50, %v769_v49 }
 0x13e   : > { %v733_v56 = vrot.slane %v732_v53, 4  ;;  %v801_v57 = vadd.f32 %v800_v54, %v770_v52 }
 0x140   : > { %v734_v41 = vadd.f32 %v733_v56, %v732_v53  ;;  %v802_v58 = vrot.slane %v801_v57, 4 }
 0x142   : > { %v735_v55 = vrot.slane %v734_v41, 2  ;;  %v803_v60 = vadd.f32 %v802_v58, %v801_v57 }
 0x144   : > { %v736_v61 = vadd.f32 %v735_v55, %v734_v41  ;;  %v804_v0 = vrot.slane %v803_v60, 2 }
 0x146   : > { %v737_v1 = vrot.slane %v736_v61, 1  ;;  %v805_v3 = vadd.f32 %v804_v0, %v803_v60 }
 0x148   : > { %v806_v51 = vrot.slane %v805_v3, 1  ;;  %v738_v63 = vadd.f32 %v737_v1, %v736_v61 }
 0x14a   : > { %v807_v4 = vadd.f32 %v806_v51, %v805_v3 }
 0x14c   : > { %v809_v6 = vsel %vm808_vm0, %v738_v63, %v807_v4 }
 0x14d   : > { %810 = vst [vmem:[%s229_s9] sm:$0x3] %v809_v6 }
 0x14e PF: > { %s14_s14 = sadd.s32 1, %s1160_s14   ;;  %s1428_s12 = smov %s1156_s13 }
 0x14f   : > { %p11_p6 = scmp.ge.s32.totalorder %s14_s14, 4   ;;  %s1429_s13 = smov %s1431_s15 }
 0x151   :  { %13 = sbr.rel (!%p11_p6) target bundleno = 2 (0x2), region = 81 }

</bundles_post_ra>
